<compile_context>
chip_gen: v6e
topology: v6e:2x2x1
jax: 0.10.0
libtpu: 0.0.40
codegen_flags: <defaults>
</compile_context>

<pallas_src>
import functools
import math

import jax
import jax.numpy as jnp
from jax.experimental import pallas as pl
from jax.experimental.pallas import tpu as pltpu

LANE = 128
SUBLANE = 8
VREG_ELEMS = SUBLANE * LANE                 # 1024 elements per f32 vreg

VMEM_BUFFER_BUDGET = 24 * 1024 * 1024       # budget for all double-buffered blocks
VMEM_LIMIT_BYTES = 48 * 1024 * 1024         # raise scoped VMEM (v5e default: 16 MiB)
MIN_BLOCK_BYTES = 1 * 1024 * 1024           # >=1 MiB/block ~ 85%+ of HBM roofline (v6e sweep)
MIN_GRID_STEPS = 8                          # let v7x shard the parallel axis across 2 TCs
SMALL_INPUT_BYTES = 256 * 1024              # below this per input, fused XLA wins


def _round_up(x, m):
    return ((x + m - 1) // m) * m


def _pick_block(length, elems_per_unit, align_units, n, itemsize):
    """Block length (in 'units' along the tiled axis) for a streaming weighted add.

    - capped so 2*(n+1) double-buffered blocks fit in VMEM_BUFFER_BUDGET,
    - floored at MIN_BLOCK_BYTES per block (per-step overhead amortization),
    - also capped so the grid has >= MIN_GRID_STEPS steps when possible.
    """
    bytes_per_unit = elems_per_unit * itemsize
    n_bufs = 2 * (n + 1)  # double-buffered inputs + output
    cap = (VMEM_BUFFER_BUDGET // (n_bufs * bytes_per_unit)) // align_units * align_units
    cap = max(align_units, cap)
    floor = _round_up(max(1, MIN_BLOCK_BYTES // bytes_per_unit), align_units)
    split = _round_up(pl.cdiv(length, MIN_GRID_STEPS), align_units)
    block = max(floor, split)
    block = min(block, cap, _round_up(length, align_units))
    return max(align_units, block)


def _weighted_add_kernel(w_ref, *refs, n):
    # w_ref: (n,) softmax weights in SMEM (scalar prefetch, already normalized).
    # refs:  n input blocks, then the output block (1-D or 2-D; body is shape-agnostic).
    x_refs = refs[:n]
    o_ref = refs[n]
    acc = x_refs[0][...].astype(jnp.float32) * w_ref[0]
    for i in range(1, n):  # n is small & static -> fully unrolled VPU FMAs
        acc = acc + x_refs[i][...].astype(jnp.float32) * w_ref[i]
    o_ref[...] = acc.astype(o_ref.dtype)


def adaptive_weighted_add(weight, *inputs, small_input_bytes=SMALL_INPUT_BYTES):
    """weight: (n,) raw parameter (softmax applied here). inputs: n arrays, same shape/dtype."""
    n = weight.shape[0]
    assert n >= 1 and len(inputs) == n
    shape = inputs[0].shape
    dtype = inputs[0].dtype
    for x in inputs:
        assert x.shape == shape, "all inputs must share a shape"
        assert x.dtype == dtype, "all inputs must share a dtype"
    total = math.prod(shape)
    itemsize = inputs[0].dtype.itemsize

    # Softmax over n scalars: hoisted out of the sequential grid loop.
    w = jax.nn.softmax(weight.astype(jnp.float32), axis=0)  # (n,)

    # Fast path: tiny tensors are dominated by kernel dispatch; let XLA fuse it.
    if total * itemsize < small_input_bytes:
        acc = inputs[0].astype(jnp.float32) * w[0]
        for i in range(1, n):
            acc = acc + inputs[i].astype(jnp.float32) * w[i]
        return acc.astype(dtype)

    cost = pl.CostEstimate(flops=2 * n * total,
                           transcendentals=0,
                           bytes_accessed=(n + 1) * total * itemsize)

    if total % LANE == 0:
        # Common case: lane-dense 2-D slabs (rows, 128); reshape is free (contiguous).
        rows = total // LANE
        xs = [x.reshape(rows, LANE) for x in inputs]
        block_rows = _pick_block(rows, LANE, SUBLANE, n, itemsize)
        grid = (pl.cdiv(rows, block_rows),)
        out_shape = jax.ShapeDtypeStruct((rows, LANE), dtype)
        # index_maps receive the scalar-prefetch ref as a trailing positional arg.
        tile_spec = pl.BlockSpec((block_rows, LANE), lambda r, w_pref: (r, 0))
    else:
        # Ragged size: run on the flat 1-D array.  The final partial block relies on
        # Pallas blocked-spec semantics (garbage reads, masked stores), which is
        # correct for this elementwise op and avoids jnp.pad / slice copies that
        # would multiply HBM traffic on a bandwidth-bound op.
        xs = [x.reshape(total) for x in inputs]
        block_elems = _pick_block(total, 1, VREG_ELEMS, n, itemsize)
        grid = (pl.cdiv(total, block_elems),)
        out_shape = jax.ShapeDtypeStruct((total,), dtype)
        tile_spec = pl.BlockSpec((block_elems,), lambda r, w_pref: (r,))

    out = pl.pallas_call(
        functools.partial(_weighted_add_kernel, n=n),
        out_shape=out_shape,
        grid_spec=pltpu.PrefetchScalarGridSpec(
            num_scalar_prefetch=1,
            grid=grid,
            in_specs=[tile_spec] * n,
            out_specs=tile_spec,
        ),
        compiler_params=pltpu.CompilerParams(
            # Independent blocks -> "parallel".
            # TODO(synk): on v7x, pltpu.CORE_PARALLEL may be required for the grid to
            # shard across both TensorCores; the grid is sized to >= MIN_GRID_STEPS
            # steps so such sharding has work to split.
            dimension_semantics=("parallel",),
            vmem_limit_bytes=VMEM_LIMIT_BYTES,
        ),
        cost_estimate=cost,
    )(w, *xs)

    return out.reshape(shape)


def _reference(weight, *inputs):
    w = jax.nn.softmax(weight.astype(jnp.float32), axis=0)
    acc = jnp.zeros_like(inputs[0], dtype=jnp.float32)
    for i, x in enumerate(inputs):
        acc = acc + x.astype(jnp.float32) * w[i]
    return acc.astype(inputs[0].dtype)


if __name__ == "__main__":
    key = jax.random.PRNGKey(0)
    n = 2
    k_w, k0, k1, k2, k3 = jax.random.split(key, 5)

    # Module inits weight = ones; perturb deterministically so softmax is non-trivial.
    weight = jnp.ones((n,), jnp.float32) + 0.1 * jax.random.normal(k_w, (n,), jnp.float32)

    def check(a, b, tol):
        assert a.shape == b.shape and a.dtype == b.dtype
        assert jnp.allclose(a, b, atol=tol, rtol=tol), "mismatch vs reference"

    # 1) Small NCHW (as in the PyTorch module), 128-aligned total -> 2-D kernel path.
    #    small_input_bytes=0 forces the Pallas path even at demo sizes.
    B, C, H, W = 2, 4, 16, 16
    x0 = jax.random.normal(k0, (B, C, H, W), jnp.float32)
    x1 = jax.random.normal(k1, (B, C, H, W), jnp.float32)
    out = jax.block_until_ready(adaptive_weighted_add(weight, x0, x1, small_input_bytes=0))
    check(out, _reference(weight, x0, x1), 1e-5)

    # 2) Ragged total (3*5*11*13 = 2145, not a multiple of 128) -> 1-D masked-final-block path.
    y0 = jax.random.normal(k2, (3, 5, 11, 13), jnp.float32)
    y1 = jax.random.normal(k3, (3, 5, 11, 13), jnp.float32)
    out = jax.block_until_ready(adaptive_weighted_add(weight, y0, y1, small_input_bytes=0))
    check(out, _reference(weight, y0, y1), 1e-5)

    # 3) Default small-input fast path (plain fused XLA).
    out = jax.block_until_ready(adaptive_weighted_add(weight, x0, x1))
    check(out, _reference(weight, x0, x1), 1e-5)

    print("KERNEL_OK")
</pallas_src>

<mosaic_0001>
module attributes {stable_mosaic.version = 11 : i64} {
  func.func @_weighted_add_kernel(%arg0: i32, %arg1: memref<2xf32, #tpu.memory_space<smem>>, %arg2: memref<16x128xf32, #tpu.memory_space<vmem>>, %arg3: memref<16x128xf32, #tpu.memory_space<vmem>>, %arg4: memref<16x128xf32, #tpu.memory_space<vmem>>) attributes {dimension_semantics = [#tpu.dimension_semantics<parallel>], iteration_bounds = array<i64: 1>, scalar_prefetch = 1 : i64, scratch_operands = 0 : i64, tpu.core_type = #tpu.core_type<tc>, window_params = [{transform_indices = @transform_0, window_bounds = array<i64: 16, 128>}, {transform_indices = @transform_1, window_bounds = array<i64: 16, 128>}, {transform_indices = @transform_2, window_bounds = array<i64: 16, 128>}]} {
    %c0 = arith.constant 0 : index
    %c0_0 = arith.constant 0 : index
    %0 = vector.load %arg2[%c0, %c0_0] : memref<16x128xf32, #tpu.memory_space<vmem>>, vector<16x128xf32>
    %c0_1 = arith.constant 0 : index
    %1 = memref.load %arg1[%c0_1] : memref<2xf32, #tpu.memory_space<smem>>
    %2 = vector.broadcast %1 : f32 to vector<16x128xf32>
    %3 = arith.mulf %0, %2 : vector<16x128xf32>
    %c0_2 = arith.constant 0 : index
    %c0_3 = arith.constant 0 : index
    %4 = vector.load %arg3[%c0_2, %c0_3] : memref<16x128xf32, #tpu.memory_space<vmem>>, vector<16x128xf32>
    %c1 = arith.constant 1 : index
    %5 = memref.load %arg1[%c1] : memref<2xf32, #tpu.memory_space<smem>>
    %6 = vector.broadcast %5 : f32 to vector<16x128xf32>
    %7 = arith.mulf %4, %6 : vector<16x128xf32>
    %8 = arith.addf %3, %7 : vector<16x128xf32>
    %c0_4 = arith.constant 0 : index
    %c0_5 = arith.constant 0 : index
    %9 = vector.load %arg4[%c0_4, %c0_5] : memref<16x128xf32, #tpu.memory_space<vmem>>, vector<16x128xf32>
    tpu.vector_store %arg4[%c0_4, %c0_5], %8 {strides = array<i32>} : memref<16x128xf32, #tpu.memory_space<vmem>>, vector<16x128xf32>,
    return
  }
  func.func @transform_0(%arg0: i32, %arg1: memref<2xf32, #tpu.memory_space<smem>>) -> (i32, i32) {
    %c0_i32 = arith.constant 0 : i32
    %c0_i32_0 = arith.constant 0 : i32
    return %arg0, %c0_i32 : i32, i32
  }
  func.func @transform_1(%arg0: i32, %arg1: memref<2xf32, #tpu.memory_space<smem>>) -> (i32, i32) {
    %c0_i32 = arith.constant 0 : i32
    %c0_i32_0 = arith.constant 0 : i32
    return %arg0, %c0_i32 : i32, i32
  }
  func.func @transform_2(%arg0: i32, %arg1: memref<2xf32, #tpu.memory_space<smem>>) -> (i32, i32) {
    %c0_i32 = arith.constant 0 : i32
    %c0_i32_0 = arith.constant 0 : i32
    return %arg0, %c0_i32 : i32, i32
  }
}

</mosaic_0001>

<bundles_post_ra>
// kernel: tpu_custom_call.1
= control target key start
LH: loop header
LB: loop body
LE: loop exit
PB: predicated region body
PF: predicated region fallthrough
CT: control target
= control target key end

     0   :  { %s162_s12 = smov [#allocation3]   ;;  %s209_s0 = inlined_call_operand.hbm [shape: f32[2], index: 0, kind: input, shape index: {}]   ;;  %s210_s1 = inlined_call_operand.hbm [shape: f32[16,128], index: 1, kind: input, shape index: {}]   ;;  %s211_s2 = inlined_call_operand.hbm [shape: f32[16,128], index: 2, kind: input, shape index: {}]   ;;  %s212_s3 = inlined_call_operand.hbm [shape: f32[16,128], index: 3, kind: output, shape index: {}]  }
   0x1   :  { %9 = dma.hbm_to_smem %s209_s0, 16, %s162_s12, [#allocation2] }
   0x2   :  { %154 = dma.done.wait [#allocation2], 16 }
   0x3   :  { %155 = vsyncadd [#allocation2], 4294967280 }
   0x4   :  { %11 = sfence }
   0x5   :  { %12 = vsyncpa [#allocation5], 0 }
   0x6   :  { %13 = vsyncpa [#allocation8], 0 }
   0x7   :  { %14 = vsyncpa [#allocation6], 0  ;;  %s163_s15 = smov [#allocation4]  }
   0x8   :  { %s20_s16 = sshll.u32 %s163_s15, 4  ;;  %s21_s16 = int_to_ptr.vmem [resolvable:$true] %s20_s16 }
   0x9   :  { %s102_s17 = scalar_lea.vmem %s21_s16, 256  ;;  %p107_p1 = scmp.lt.s32.totalorder %s21_s16, %s21_s16 }
   0xa   :  { %p103_p0 = scmp.ne.s32.totalorder %s21_s16, %s102_s17  ;;  %p108_p2 = scmp.lt.s32.totalorder %s102_s17, %s102_s17 }
   0xc   :  { %p109_p3 = por %p108_p2, %p107_p1 }
   0xe   :  { %p110_p4 = pnand %p109_p3, %p103_p0 }
  0x10   :  { %113 = shalt.err (!%p110_p4)
}
  0x11   :  { %s164_s18 = smov 128   ;;  %s165_s19 = smov 8  }
  0x12   :  { %26 = dma.hbm_to_vmem [thread:$0]  %s210_s1, 256, %s21_s16, [#allocation5], %s164_s18, %s164_s18, %s165_s19  }
  0x13   :  { %s166_s21 = smov [#allocation7]  }
  0x14   :  { %s32_s22 = sshll.u32 %s166_s21, 4  ;;  %s33_s22 = int_to_ptr.vmem [resolvable:$true] %s32_s22 }
  0x15   :  { %s122_s23 = scalar_lea.vmem %s33_s22, 256  ;;  %p127_p6 = scmp.lt.s32.totalorder %s33_s22, %s33_s22 }
  0x16   :  { %p123_p5 = scmp.ne.s32.totalorder %s33_s22, %s122_s23  ;;  %p128_p7 = scmp.lt.s32.totalorder %s122_s23, %s122_s23 }
  0x18   :  { %p129_p8 = por %p128_p7, %p127_p6 }
  0x1a   :  { %p130_p9 = pnand %p129_p8, %p123_p5 }
  0x1c   :  { %133 = shalt.err (!%p130_p9)
}
  0x1d   :  { %38 = dma.hbm_to_vmem [thread:$0]  %s211_s2, 256, %s33_s22, [#allocation8], %s164_s18, %s164_s18, %s165_s19  }
  0x1e   :  { %156 = dma.done.wait [#allocation5], 256  }
  0x1f   :  { %157 = vsyncadd [#allocation5], 4294967040 }
  0x20   :  { %158 = dma.done.wait [#allocation8], 256  }
  0x21   :  { %159 = vsyncadd [#allocation8], 4294967040  ;;  %s47_s1 = sld [smem:[#allocation3]]  ;;  %v45_v0 = vld [vmem:[#allocation4] sm:$0xff]  ;;  %v51_v2 = vld [vmem:[#allocation7] sm:$0xff]  ;;  %s167_s27 = smov [#allocation9]  }
  0x22   :  { %s79_s26 = sld [smem:[#allocation3 + $0x1]]  ;;  %v46_v3 = vld [vmem:[#allocation4 + $0x8] sm:$0xff]  ;;  %v52_v7 = vld [vmem:[#allocation7 + $0x8] sm:$0xff]  ;;  %s66_s28 = sshll.u32 %s167_s27, 4  ;;  %s67_s28 = int_to_ptr.vmem [resolvable:$true] %s66_s28 }
  0x23   :  { %s134_s2 = scalar_lea.vmem %s67_s28, 256  ;;  %p139_p11 = scmp.lt.s32.totalorder %s67_s28, %s67_s28 }
  0x24   :  { %p135_p10 = scmp.ne.s32.totalorder %s67_s28, %s134_s2  ;;  %p140_p12 = scmp.lt.s32.totalorder %s134_s2, %s134_s2 }
  0x26   :  { %p141_p13 = por %p140_p12, %p139_p11 }
  0x27   :  { %v48_v1 = vstv %s47_s1 }
  0x28   :  { %v49_v4 = vmul.f32 %v48_v1, %v45_v0  ;;  %v54_v5 = vstv %s79_s26  ;;  %v50_v6 = vmul.f32 %v48_v1, %v46_v3  ;;  %p142_p0 = pnand %p141_p13, %p135_p10 }
  0x29   :  { %v55_v8 = vmul.f32 %v54_v5, %v51_v2  ;;  %v56_v9 = vmul.f32 %v54_v5, %v52_v7 }
  0x2b   :  { %v57_v10 = vadd.f32 %v55_v8, %v49_v4  ;;  %v58_v11 = vadd.f32 %v56_v9, %v50_v6 }
  0x2d   :  { %59 = vst [vmem:[#allocation9] sm:$0xff] %v57_v10  ;;  %60 = vst [vmem:[#allocation9 + $0x8] sm:$0xff] %v58_v11 }
  0x2e   :  { %145 = shalt.err (!%p142_p0)
}
  0x2f   :  { %72 = dma.vmem_to_hbm [thread:$0]  %s67_s28, 256, %s212_s3, [#allocation6], %s164_s18, %s164_s18, %s165_s19  }
  0x30   :  { %160 = dma.done.wait [#allocation6], 256  }
  0x31   :  { %161 = vsyncadd [#allocation6], 4294967040 }
  0x32   :  { %76 = vsyncpa [#allocation5], 1 }
  0x33   :  { %77 = vsyncpa [#allocation8], 1 }
  0x34   :  { %78 = vsyncpa [#allocation6], 1 }

</bundles_post_ra>
